<compile_context>
chip_gen: v5e
topology: v5e:2x2
jax: 0.10.0
libtpu: 0.0.40
codegen_flags: <defaults>
</compile_context>

<pallas_src>
import functools

import jax
import jax.numpy as jnp
from jax.experimental import pallas as pl
from jax.experimental.pallas import tpu as pltpu


_NEG_BIG = -1e30  # effectively -inf for softmax padding, avoids inf arithmetic


def _policy_kernel(x_ref, w1_ref, b1_ref, w2_ref, b2_ref, w3_ref, b3_ref,
                   out_ref):
    """Fused MLP forward: relu(x@W1+b1) -> relu(@W2+b2) -> softmax(@W3+b3)."""
    x = x_ref[...]                                            # (bm, S)

    # fc1 + relu  (MXU matmul, f32 accumulate)
    h1 = jnp.dot(x, w1_ref[...], preferred_element_type=jnp.float32)
    h1 = jnp.maximum(h1 + b1_ref[...], 0.0)                   # (bm, 128)

    # fc2 + relu (zero-padded to 128 lanes -> lane-dense, padded cols stay 0)
    h2 = jnp.dot(h1, w2_ref[...], preferred_element_type=jnp.float32)
    h2 = jnp.maximum(h2 + b2_ref[...], 0.0)                   # (bm, 128)

    # action_head (padded to 128 lanes) + softmax over last axis.
    # Padded columns carry bias -1e30 -> exp() == 0, so they contribute
    # nothing to the denominator; padded w3 rows are 0 so the zero-padded h2
    # columns contribute nothing either.
    logits = jnp.dot(h2, w3_ref[...], preferred_element_type=jnp.float32)
    logits = logits + b3_ref[...]                             # (bm, A_pad)
    m = jnp.max(logits, axis=-1, keepdims=True)
    e = jnp.exp(logits - m)
    denom = jnp.sum(e, axis=-1, keepdims=True)
    # Approx reciprocal runs in the otherwise-idle EUP slot.
    probs = e * pl.reciprocal(denom, approx=True)
    # Only the real action columns are written back (masked vst for tiny A,
    # but ~32x fewer HBM bytes than a padded (bm, 128) writeback).
    a_dim = out_ref.shape[-1]
    out_ref[...] = probs[:, :a_dim].astype(out_ref.dtype)


def _round_up(v, m):
    return ((v + m - 1) // m) * m


def _num_tensorcores():
    """2 on v7x (two TensorCores per chip), 1 on v5e/v6e; defensive fallback."""
    try:
        kind = jax.devices()[0].device_kind.lower()
        if "v7" in kind:
            return 2
    except Exception:
        pass
    return 1


@functools.partial(jax.jit, static_argnames=("block_b",))
def policy_forward(x, params, block_b=1024):
    """x: (B, state_dim) f32 -> (B, action_dim) action probabilities."""
    w1, b1, w2, b2, w3, b3 = (params["w1"], params["b1"], params["w2"],
                              params["b2"], params["w3"], params["b3"])
    B, S = x.shape
    H2 = w2.shape[1]
    A = w3.shape[1]

    # Lane-dense hidden: zero-pad fc2 to 128 output columns (relu(0+0)=0) and
    # zero-pad the matching action-head rows so padded columns never matter.
    H2_pad = max(128, _round_up(H2, 128))
    if H2_pad != H2:
        w2 = jnp.pad(w2, ((0, 0), (0, H2_pad - H2)))
        b2 = jnp.pad(b2, ((0, 0), (0, H2_pad - H2)))
        w3 = jnp.pad(w3, ((0, H2_pad - H2), (0, 0)))

    # Lane-dense logits for the in-kernel softmax reductions: pad the action
    # head to a multiple of 128 columns with bias -1e30 (exp underflows to 0).
    A_pad = max(128, _round_up(A, 128))
    if A_pad != A:
        w3p = jnp.pad(w3, ((0, 0), (0, A_pad - A)))
        b3p = jnp.pad(b3, ((0, 0), (0, A_pad - A)), constant_values=_NEG_BIG)
    else:
        w3p, b3p = w3, b3

    # Batch tile selection.
    #  * Tiles are multiples of 8 (sublane) or the full batch extent.
    #  * On v7x (2 TensorCores) keep >= 2 grid steps for non-trivial batches
    #    so both cores get work; on single-TC v5e/v6e never force an extra
    #    grid step (pure overhead there).
    n_tc = _num_tensorcores()
    block_cap = _round_up(block_b, 8)
    if n_tc >= 2 and B > 16:
        bm = min(block_cap, _round_up(pl.cdiv(B, n_tc), 8))
    elif B <= block_cap:
        bm = B                                    # single full-extent block
    else:
        bm = block_cap
    grid = (pl.cdiv(B, bm),)

    # Weights/biases are broadcast to every batch tile (index_map -> block 0);
    # Pallas keeps them resident across grid steps (no re-DMA).
    bcast2d = lambda arr: pl.BlockSpec(arr.shape, lambda i: (0, 0))

    # TODO(synk): if xprof on v7x shows one core idle under "parallel",
    # switch the batch axis to pltpu.CORE_PARALLEL / pl.core_map.
    out = pl.pallas_call(
        _policy_kernel,
        out_shape=jax.ShapeDtypeStruct((B, A), jnp.float32),
        grid_spec=pltpu.PrefetchScalarGridSpec(
            num_scalar_prefetch=0,
            grid=grid,
            in_specs=[
                pl.BlockSpec((bm, S), lambda i: (i, 0)),      # x tile
                bcast2d(w1),                                  # (S, 128)
                bcast2d(b1),                                  # (1, 128)
                bcast2d(w2),                                  # (128, 128)
                bcast2d(b2),                                  # (1, 128)
                bcast2d(w3p),                                 # (128, A_pad)
                bcast2d(b3p),                                 # (1, A_pad)
            ],
            out_specs=pl.BlockSpec((bm, A), lambda i: (i, 0)),
        ),
        compiler_params=pltpu.CompilerParams(
            dimension_semantics=("parallel",),
            vmem_limit_bytes=32 * 1024 * 1024),
    )(x, w1, b1, w2, b2, w3p, b3p)

    return out


def init_policy_params(key, state_dim, action_dim):
    """Deterministic init matching nn.Linear's U(-1/sqrt(fan_in), 1/sqrt(fan_in)).
    Weights stored as (in_features, out_features)."""
    dims = [(state_dim, 128), (128, 64), (64, action_dim)]
    params = {}
    keys = jax.random.split(key, 2 * len(dims))
    for n, (fan_in, fan_out) in enumerate(dims):
        bound = 1.0 / jnp.sqrt(float(fan_in))
        w = jax.random.uniform(keys[2 * n], (fan_in, fan_out),
                               minval=-bound, maxval=bound, dtype=jnp.float32)
        b = jax.random.uniform(keys[2 * n + 1], (1, fan_out),
                               minval=-bound, maxval=bound, dtype=jnp.float32)
        params[f"w{n + 1}"] = w
        params[f"b{n + 1}"] = b
    return params


def policy_forward_ref(x, params):
    """Pure-JAX reference of Policy.forward for validation."""
    h = jax.nn.relu(x @ params["w1"] + params["b1"])
    h = jax.nn.relu(h @ params["w2"] + params["b2"])
    return jax.nn.softmax(h @ params["w3"] + params["b3"], axis=-1)


if __name__ == "__main__":
    state_dim, action_dim = 32, 4

    key = jax.random.PRNGKey(0)
    pkey, xkey = jax.random.split(key)
    params = init_policy_params(pkey, state_dim, action_dim)

    # Small batch (single full-extent block), a mid batch, and a batch larger
    # than the tile cap that exercises a >=2-step grid with a clamped
    # (overlapping, benign) trailing block.
    for batch in (2, 300, 1500):
        xk = jax.random.fold_in(xkey, batch)
        x = jax.random.normal(xk, (batch, state_dim), dtype=jnp.float32)

        probs = jax.block_until_ready(policy_forward(x, params))
        ref = policy_forward_ref(x, params)

        assert probs.shape == (batch, action_dim)
        # pl.reciprocal(approx=True) carries ~2^-12 relative error -> relaxed tol.
        assert jnp.allclose(jnp.sum(probs, axis=-1), 1.0, atol=2e-3)
        assert jnp.allclose(probs, ref, atol=2e-3, rtol=2e-3)

    print("KERNEL_OK")
</pallas_src>

<mosaic_0001>
module attributes {stable_mosaic.version = 11 : i64} {
  func.func @_policy_kernel(%arg0: i32, %arg1: memref<2x32xf32, #tpu.memory_space<vmem>>, %arg2: memref<32x128xf32, #tpu.memory_space<vmem>>, %arg3: memref<1x128xf32, #tpu.memory_space<vmem>>, %arg4: memref<128x128xf32, #tpu.memory_space<vmem>>, %arg5: memref<1x128xf32, #tpu.memory_space<vmem>>, %arg6: memref<128x128xf32, #tpu.memory_space<vmem>>, %arg7: memref<1x128xf32, #tpu.memory_space<vmem>>, %arg8: memref<2x4xf32, #tpu.memory_space<vmem>>) attributes {dimension_semantics = [#tpu.dimension_semantics<parallel>], iteration_bounds = array<i64: 1>, scalar_prefetch = 0 : i64, scratch_operands = 0 : i64, tpu.core_type = #tpu.core_type<tc>, window_params = [{transform_indices = @transform_0, window_bounds = array<i64: 2, 32>}, {pipeline_mode = #tpu.pipeline_mode<synchronous>, transform_indices = @transform_1, window_bounds = array<i64: 32, 128>}, {pipeline_mode = #tpu.pipeline_mode<synchronous>, transform_indices = @transform_2, window_bounds = array<i64: 1, 128>}, {pipeline_mode = #tpu.pipeline_mode<synchronous>, transform_indices = @transform_3, window_bounds = array<i64: 128, 128>}, {pipeline_mode = #tpu.pipeline_mode<synchronous>, transform_indices = @transform_4, window_bounds = array<i64: 1, 128>}, {pipeline_mode = #tpu.pipeline_mode<synchronous>, transform_indices = @transform_5, window_bounds = array<i64: 128, 128>}, {pipeline_mode = #tpu.pipeline_mode<synchronous>, transform_indices = @transform_6, window_bounds = array<i64: 1, 128>}, {transform_indices = @transform_7, window_bounds = array<i64: 2, 4>}]} {
    %c0 = arith.constant 0 : index
    %c0_0 = arith.constant 0 : index
    %0 = vector.load %arg1[%c0, %c0_0] : memref<2x32xf32, #tpu.memory_space<vmem>>, vector<2x32xf32>
    %c0_1 = arith.constant 0 : index
    %c0_2 = arith.constant 0 : index
    %1 = vector.load %arg2[%c0_1, %c0_2] : memref<32x128xf32, #tpu.memory_space<vmem>>, vector<32x128xf32>
    %cst = arith.constant dense<0.000000e+00> : vector<2x128xf32>
    %2 = tpu.matmul %0, %1, %cst {dimension_numbers = #tpu.dot_dimension_numbers<[1], [0], [0], [1], [0, 0, 1, 1], [], []>} : vector<2x32xf32>, vector<32x128xf32>, vector<2x128xf32> -> vector<2x128xf32>
    %c0_3 = arith.constant 0 : index
    %c0_4 = arith.constant 0 : index
    %3 = vector.load %arg3[%c0_3, %c0_4] : memref<1x128xf32, #tpu.memory_space<vmem>>, vector<1x128xf32>
    %4 = vector.broadcast %3 : vector<1x128xf32> to vector<2x128xf32>
    %5 = arith.addf %2, %4 : vector<2x128xf32>
    %cst_5 = arith.constant 0.000000e+00 : f32
    %6 = vector.broadcast %cst_5 : f32 to vector<2x128xf32>
    %7 = arith.maximumf %5, %6 : vector<2x128xf32>
    %c0_6 = arith.constant 0 : index
    %c0_7 = arith.constant 0 : index
    %8 = vector.load %arg4[%c0_6, %c0_7] : memref<128x128xf32, #tpu.memory_space<vmem>>, vector<128x128xf32>
    %cst_8 = arith.constant dense<0.000000e+00> : vector<2x128xf32>
    %9 = tpu.matmul %7, %8, %cst_8 {dimension_numbers = #tpu.dot_dimension_numbers<[1], [0], [0], [1], [0, 0, 1, 1], [], []>} : vector<2x128xf32>, vector<128x128xf32>, vector<2x128xf32> -> vector<2x128xf32>
    %c0_9 = arith.constant 0 : index
    %c0_10 = arith.constant 0 : index
    %10 = vector.load %arg5[%c0_9, %c0_10] : memref<1x128xf32, #tpu.memory_space<vmem>>, vector<1x128xf32>
    %11 = vector.broadcast %10 : vector<1x128xf32> to vector<2x128xf32>
    %12 = arith.addf %9, %11 : vector<2x128xf32>
    %cst_11 = arith.constant 0.000000e+00 : f32
    %13 = vector.broadcast %cst_11 : f32 to vector<2x128xf32>
    %14 = arith.maximumf %12, %13 : vector<2x128xf32>
    %c0_12 = arith.constant 0 : index
    %c0_13 = arith.constant 0 : index
    %15 = vector.load %arg6[%c0_12, %c0_13] : memref<128x128xf32, #tpu.memory_space<vmem>>, vector<128x128xf32>
    %cst_14 = arith.constant dense<0.000000e+00> : vector<2x128xf32>
    %16 = tpu.matmul %14, %15, %cst_14 {dimension_numbers = #tpu.dot_dimension_numbers<[1], [0], [0], [1], [0, 0, 1, 1], [], []>} : vector<2x128xf32>, vector<128x128xf32>, vector<2x128xf32> -> vector<2x128xf32>
    %c0_15 = arith.constant 0 : index
    %c0_16 = arith.constant 0 : index
    %17 = vector.load %arg7[%c0_15, %c0_16] : memref<1x128xf32, #tpu.memory_space<vmem>>, vector<1x128xf32>
    %18 = vector.broadcast %17 : vector<1x128xf32> to vector<2x128xf32>
    %19 = arith.addf %16, %18 : vector<2x128xf32>
    %cst_17 = arith.constant dense<0xFF800000> : vector<2xf32>
    %20 = vector.multi_reduction <maximumf>, %19, %cst_17 [1] : vector<2x128xf32> to vector<2xf32>
    %21 = vector.shape_cast %20 : vector<2xf32> to vector<2x1xf32>
    %22 = vector.broadcast %21 : vector<2x1xf32> to vector<2x128xf32>
    %23 = arith.subf %19, %22 : vector<2x128xf32>
    %24 = math.exp %23 : vector<2x128xf32>
    %cst_18 = arith.constant dense<0.000000e+00> : vector<2xf32>
    %25 = vector.multi_reduction <add>, %24, %cst_18 [1] : vector<2x128xf32> to vector<2xf32>
    %26 = vector.shape_cast %25 : vector<2xf32> to vector<2x1xf32>
    %27 = tpu.reciprocal %26 {approx = true} : vector<2x1xf32> -> vector<2x1xf32>
    %28 = vector.broadcast %27 : vector<2x1xf32> to vector<2x128xf32>
    %29 = arith.mulf %24, %28 : vector<2x128xf32>
    %30 = vector.extract_strided_slice %29 {offsets = [0, 0], sizes = [2, 4], strides = [1, 1]} : vector<2x128xf32> to vector<2x4xf32>
    %c0_19 = arith.constant 0 : index
    %c0_20 = arith.constant 0 : index
    %31 = vector.load %arg8[%c0_19, %c0_20] : memref<2x4xf32, #tpu.memory_space<vmem>>, vector<2x4xf32>
    tpu.vector_store %arg8[%c0_19, %c0_20], %30 {strides = array<i32>} : memref<2x4xf32, #tpu.memory_space<vmem>>, vector<2x4xf32>,
    return
  }
  func.func @transform_0(%arg0: i32) -> (i32, i32) {
    %c0_i32 = arith.constant 0 : i32
    %c0_i32_0 = arith.constant 0 : i32
    return %arg0, %c0_i32 : i32, i32
  }
  func.func @transform_1(%arg0: i32) -> (i32, i32) {
    %c0_i32 = arith.constant 0 : i32
    %c0_i32_0 = arith.constant 0 : i32
    %c0_i32_1 = arith.constant 0 : i32
    return %c0_i32, %c0_i32_0 : i32, i32
  }
  func.func @transform_2(%arg0: i32) -> (i32, i32) {
    %c0_i32 = arith.constant 0 : i32
    %c0_i32_0 = arith.constant 0 : i32
    %c0_i32_1 = arith.constant 0 : i32
    return %c0_i32, %c0_i32_0 : i32, i32
  }
  func.func @transform_3(%arg0: i32) -> (i32, i32) {
    %c0_i32 = arith.constant 0 : i32
    %c0_i32_0 = arith.constant 0 : i32
    %c0_i32_1 = arith.constant 0 : i32
    return %c0_i32, %c0_i32_0 : i32, i32
  }
  func.func @transform_4(%arg0: i32) -> (i32, i32) {
    %c0_i32 = arith.constant 0 : i32
    %c0_i32_0 = arith.constant 0 : i32
    %c0_i32_1 = arith.constant 0 : i32
    return %c0_i32, %c0_i32_0 : i32, i32
  }
  func.func @transform_5(%arg0: i32) -> (i32, i32) {
    %c0_i32 = arith.constant 0 : i32
    %c0_i32_0 = arith.constant 0 : i32
    %c0_i32_1 = arith.constant 0 : i32
    return %c0_i32, %c0_i32_0 : i32, i32
  }
  func.func @transform_6(%arg0: i32) -> (i32, i32) {
    %c0_i32 = arith.constant 0 : i32
    %c0_i32_0 = arith.constant 0 : i32
    %c0_i32_1 = arith.constant 0 : i32
    return %c0_i32, %c0_i32_0 : i32, i32
  }
  func.func @transform_7(%arg0: i32) -> (i32, i32) {
    %c0_i32 = arith.constant 0 : i32
    %c0_i32_0 = arith.constant 0 : i32
    return %arg0, %c0_i32 : i32, i32
  }
}

</mosaic_0001>

<bundles_post_ra>
// kernel: policy_forward.1
= control target key start
LH: loop header
LB: loop body
LE: loop exit
PB: predicated region body
PF: predicated region fallthrough
CT: control target
= control target key end

     0   :  { %vm36_vm0 = vcmask 261120   ;;  %s371_s0 = inlined_call_operand.vmem [shape: f32[2,32], index: 0, kind: input, shape index: {}]   ;;  %s372_s1 = inlined_call_operand.vmem [shape: f32[32,128], index: 1, kind: input, shape index: {}]   ;;  %s373_s2 = inlined_call_operand.vmem [shape: f32[1,128], index: 2, kind: input, shape index: {}]   ;;  %s374_s3 = inlined_call_operand.vmem [shape: f32[128,128], index: 3, kind: input, shape index: {}]   ;;  %s375_s4 = inlined_call_operand.vmem [shape: f32[1,128], index: 4, kind: input, shape index: {}]   ;;  %s376_s5 = inlined_call_operand.vmem [shape: f32[128,128], index: 5, kind: input, shape index: {}]   ;;  %s377_s6 = inlined_call_operand.vmem [shape: f32[1,128], index: 6, kind: input, shape index: {}]   ;;  %s378_s7 = inlined_call_operand.hbm [shape: f32[2,4], index: 7, kind: output, shape index: {}]  }
   0x1   :  { %v31_v0 = vld [vmem:[%s372_s1 + $0x18] sm:$0xff]  ;;  %v30_v1 = vld [vmem:[%s372_s1 + $0x10] sm:$0xff]  ;;  %v29_v3 = vld [vmem:[%s372_s1 + $0x8] sm:$0xff] }
   0x2   :  { %52 = vmatpush.msra.mxu0 %v31_v0  ;;  %v76_v2 = vld [vmem:[%s374_s3 + $0x78] sm:$0xff]  ;;  %v75_v4 = vld [vmem:[%s374_s3 + $0x70] sm:$0xff]  ;;  %v74_v5 = vld [vmem:[%s374_s3 + $0x68] sm:$0xff] }
   0x3   :  { %81 = vmatpush.msra.mxu1 %v76_v2  ;;  %v28_v6 = vld [vmem:[%s372_s1] sm:$0xff]  ;;  %v72_v9 = vld [vmem:[%s374_s3 + $0x58] sm:$0xff] }
   0x4   :  { %53 = vmatpush.msra.mxu0 %v30_v1  ;;  %v27_v7 = vld [vmem:[%s371_s0] sm:$0x3] }
   0x5   :  { %82 = vmatpush.msra.mxu1 %v75_v4  ;;  %v73_v8 = vld [vmem:[%s374_s3 + $0x60] sm:$0xff] }
   0x6   :  { %54 = vmatpush.msra.mxu0 %v29_v3 }
   0x7   :  { %83 = vmatpush.msra.mxu1 %v74_v5 }
   0x8   :  { %55 = vmatpush.msra.mxu0 %v28_v6 }
   0x9   :  { %12 = vsyncpa [#allocation3], 0  ;;  %172 = vmatmul.msk.f32.vlgmr.msra.gmra.mxu0 %vm36_vm0, %v27_v7  ;;  %84 = vmatpush.msra.mxu1 %v73_v8  ;;  %v71_v10 = vld [vmem:[%s374_s3 + $0x50] sm:$0xff]  ;;  %v70_v11 = vld [vmem:[%s374_s3 + $0x48] sm:$0xff]  ;;  %vm142_vm1 = vcmask 1041408   ;;  %vm154_vm2 = vcmask 25600  }
   0xa   :  { %v69_v12 = vld [vmem:[%s374_s3 + $0x40] sm:$0xff]  ;;  %v68_v13 = vld [vmem:[%s374_s3 + $0x38] sm:$0xff]  ;;  %v67_v14 = vld [vmem:[%s374_s3 + $0x30] sm:$0xff] }
   0xb   :  { %85 = vmatpush.msra.mxu1 %v72_v9  ;;  %v66_v15 = vld [vmem:[%s374_s3 + $0x28] sm:$0xff]  ;;  %v65_v16 = vld [vmem:[%s374_s3 + $0x20] sm:$0xff]  ;;  %v64_v17 = vld [vmem:[%s374_s3 + $0x18] sm:$0xff] }
   0xc   :  { %v63_v18 = vld [vmem:[%s374_s3 + $0x10] sm:$0xff]  ;;  %v62_v19 = vld [vmem:[%s374_s3 + $0x8] sm:$0xff]  ;;  %v61_v20 = vld [vmem:[%s374_s3] sm:$0xff] }
   0xd   :  { %86 = vmatpush.msra.mxu1 %v71_v10  ;;  %v117_v21 = vld [vmem:[%s376_s5 + $0x78] sm:$0xff]  ;;  %v116_v22 = vld [vmem:[%s376_s5 + $0x70] sm:$0xff]  ;;  %v115_v23 = vld [vmem:[%s376_s5 + $0x68] sm:$0xff] }
   0xe   :  { %122 = vmatpush.msra.mxu2 %v117_v21  ;;  %v114_v24 = vld [vmem:[%s376_s5 + $0x60] sm:$0xff]  ;;  %v113_v25 = vld [vmem:[%s376_s5 + $0x58] sm:$0xff]  ;;  %v112_v26 = vld [vmem:[%s376_s5 + $0x50] sm:$0xff] }
   0xf   :  { %87 = vmatpush.msra.mxu1 %v70_v11  ;;  %v111_v27 = vld [vmem:[%s376_s5 + $0x48] sm:$0xff]  ;;  %v110_v28 = vld [vmem:[%s376_s5 + $0x40] sm:$0xff]  ;;  %v109_v29 = vld [vmem:[%s376_s5 + $0x38] sm:$0xff] }
  0x10   :  { %123 = vmatpush.msra.mxu2 %v116_v22  ;;  %v108_v30 = vld [vmem:[%s376_s5 + $0x30] sm:$0xff]  ;;  %v107_v31 = vld [vmem:[%s376_s5 + $0x28] sm:$0xff]  ;;  %v106_v32 = vld [vmem:[%s376_s5 + $0x20] sm:$0xff] }
  0x11   :  { %88 = vmatpush.msra.mxu1 %v69_v12  ;;  %v105_v33 = vld [vmem:[%s376_s5 + $0x18] sm:$0xff]  ;;  %v174_v34 = vld [vmem:[%s373_s2] ss:$0 sm:$0xff]  ;;  %v104_v38 = vld [vmem:[%s376_s5 + $0x10] sm:$0xff] }
  0x12   :  { %124 = vmatpush.msra.mxu2 %v115_v23  ;;  %v103_v39 = vld [vmem:[%s376_s5 + $0x8] sm:$0xff]  ;;  %v102_v40 = vld [vmem:[%s376_s5] sm:$0xff] }
  0x13   :  { %89 = vmatpush.msra.mxu1 %v68_v13  ;;  %v175_v41 = vld [vmem:[%s375_s4] ss:$0 sm:$0xff]  ;;  %s207_s4 = smov [#allocation2]  }
  0x14   :  { %125 = vmatpush.msra.mxu2 %v114_v24  ;;  %v176_v45 = vld [vmem:[%s377_s6] ss:$0 sm:$0xff]  ;;  %s161_s5 = sshll.u32 %s207_s4, 4  ;;  %s163_s6 = sshll.u32 %s378_s7, 4  ;;  %s162_s5 = int_to_ptr.vmem [resolvable:$true] %s161_s5  ;;  %s164_s6 = int_to_ptr.hbm [resolvable:$true] %s163_s6 }
  0x15   :  { %90 = vmatpush.msra.mxu1 %v67_v14 }
  0x16   :  { %126 = vmatpush.msra.mxu2 %v113_v25 }
  0x17   :  { %91 = vmatpush.msra.mxu1 %v66_v15 }
  0x18   :  { %127 = vmatpush.msra.mxu2 %v112_v26 }
  0x19   :  { %92 = vmatpush.msra.mxu1 %v65_v16 }
  0x1a   :  { %128 = vmatpush.msra.mxu2 %v111_v27 }
  0x1b   :  { %93 = vmatpush.msra.mxu1 %v64_v17 }
  0x1c   :  { %129 = vmatpush.msra.mxu2 %v110_v28 }
  0x1d   :  { %94 = vmatpush.msra.mxu1 %v63_v18 }
  0x1e   :  { %130 = vmatpush.msra.mxu2 %v109_v29 }
  0x1f   :  { %95 = vmatpush.msra.mxu1 %v62_v19 }
  0x20   :  { %131 = vmatpush.msra.mxu2 %v108_v30 }
  0x21   :  { %96 = vmatpush.msra.mxu1 %v61_v20 }
  0x22   :  { %132 = vmatpush.msra.mxu2 %v107_v31 }
  0x24   :  { %133 = vmatpush.msra.mxu2 %v106_v32 }
  0x26   :  { %134 = vmatpush.msra.mxu2 %v105_v33 }
  0x28   :  { %135 = vmatpush.msra.mxu2 %v104_v38 }
  0x2a   :  { %136 = vmatpush.msra.mxu2 %v103_v39 }
  0x2c   :  { %137 = vmatpush.msra.mxu2 %v102_v40 }
  0x86   :  { %v57_v35 = vpop.f32.mrf.mxu0 }
  0x87   :  { %v58_v36 = vadd.f32 %v174_v34, %v57_v35 }
  0x89   :  { %v60_v37 = vmax.f32 %v58_v36, 0.0 }
  0x8b   :  { %97 = vmatmul.f32.vlgmr.msra.gmra.mxu1 %v60_v37 }
 0x108   :  { %v98_v42 = vpop.f32.mrf.mxu1 }
 0x109   :  { %v99_v43 = vadd.f32 %v175_v41, %v98_v42 }
 0x10b   :  { %v101_v44 = vmax.f32 %v99_v43, 0.0 }
 0x10d   :  { %138 = vmatmul.f32.vlgmr.msra.gmra.mxu2 %v101_v44 }
 0x190   :  { %v139_v46 = vpop.f32.mrf.mxu2 }
 0x191   :  { %v140_v47 = vadd.f32 %v176_v45, %v139_v46 }
 0x193   :  { %v143_v48 = vsel %vm142_vm1, %v140_v47, -inf }
 0x194   :  { %144 = vmax.xlane.f32.xlu0 %v143_v48 }
 0x207   :  { %v145_v49 = vpop.xlane.xlu0 %144 }
 0x208   :  { %v146_v50 = vsub.f32 %v140_v47, %v145_v49 }
 0x20a   :  { %v147_v51 = vmul.f32 1.442695, %v146_v50 }
 0x20c   :  { %177 = vpow2.f32 %v147_v51 }
 0x212   :  { %v178_v52 = vpop.eup %177 }
 0x213   :  { %v149_v53 = vsel %vm142_vm1, %v178_v52, 0.0 }
 0x214   :  { %150 = vadd.xlane.f32.xlu0 %v149_v53 }
 0x287   :  { %v151_v54 = vpop.xlane.xlu0 %150 }
 0x288   :  { %179 = vrcp.f32 %v151_v54 }
 0x28e   :  { %v180_v55 = vpop.eup %179 }
 0x28f   :  { %v153_v56 = vmul.f32 %v180_v55, %v178_v52 }
 0x291   :  { %155 = vst.msk [vmem:[#allocation2] sm:$0x3] %vm154_vm2, %v153_v56 }
 0x292   :  { %166 = dma.vmem_to_hbm [thread:$0]  %s162_s5, 32, %s164_s6, [#allocation3]  }
 0x293   :  { %205 = dma.done.wait [#allocation3], 32  }
 0x294   :  { %206 = vsyncadd [#allocation3], 4294967264 }
 0x295   :  { %171 = vsyncpa [#allocation3], 1 }

</bundles_post_ra>
